<compile_context>
chip_gen: v6e
topology: v6e:2x2x1
jax: 0.10.0
libtpu: 0.0.40
codegen_flags: <defaults>
</compile_context>

<pallas_src>
import jax
import jax.numpy as jnp
from jax.experimental import pallas as pl
from jax.experimental.pallas import tpu as pltpu


def _gather_kernel(ids_ref, table_ref, out_ref):
    # ids_ref:   (TB, 1)  int32  -- token ids for this block of tokens
    # table_ref: (V, E)   float  -- full embedding table, resident in VMEM
    # out_ref:   (TB, E)
    tb = ids_ref.shape[0]
    v = table_ref.shape[0]

    ids = ids_ref[...]                                          # (TB, 1)
    cols = jax.lax.broadcasted_iota(jnp.int32, (tb, v), 1)      # (TB, V)
    onehot = (ids == cols).astype(table_ref.dtype)              # (TB, V)

    # One-hot x table on the MXU == exact row gather (1.0 * x + 0.0 * ...).
    out_ref[...] = jnp.dot(
        onehot, table_ref[...], preferred_element_type=jnp.float32
    ).astype(out_ref.dtype)


def var_embedding(data, word_representer, *, token_block=8):
    """JAX/Pallas equivalent of VarEmbedding.forward / VarEmbedding.lookup.

    data:              integer index array of any rank (the reference handles
                       2-D specially, but flatten+reshape reproduces both
                       branches exactly).
    word_representer:  callable returning the (V, E) embedding matrix, or the
                       matrix itself.
    token_block:       tokens gathered per grid step (sublane-aligned).  For
                       large token counts raise this (e.g. 128/256) to keep
                       grid steps fat; 8 already gives >=2 steps at demo size.
    """
    var = word_representer() if callable(word_representer) else word_representer
    v, e = var.shape

    orig_shape = data.shape
    flat = data.reshape(-1).astype(jnp.int32)           # free row-major view
    n = flat.shape[0]

    n_blocks = max(1, (n + token_block - 1) // token_block)
    n_pad = n_blocks * token_block
    if n_pad != n:
        # Pad with index 0 (valid row); padded rows are sliced off below.
        flat = jnp.pad(flat, (0, n_pad - n))
    ids2d = flat.reshape(n_pad, 1)

    grid_spec = pltpu.PrefetchScalarGridSpec(
        num_scalar_prefetch=0,
        grid=(n_blocks,),
        in_specs=[
            # Token-id column for this block of tokens.
            pl.BlockSpec((token_block, 1), lambda i: (i, 0)),
            # Full embedding table; constant block index -> DMA'd once,
            # reused across all grid steps.
            pl.BlockSpec((v, e), lambda i: (0, 0)),
        ],
        out_specs=pl.BlockSpec((token_block, e), lambda i: (i, 0)),
    )

    out = pl.pallas_call(
        _gather_kernel,
        out_shape=jax.ShapeDtypeStruct((n_pad, e), var.dtype),
        grid_spec=grid_spec,
        compiler_params=pltpu.CompilerParams(
            dimension_semantics=("parallel",)),   # v7x: both TCs usable
    )(ids2d, var)

    out = out[:n]
    return out.reshape(*orig_shape, e)


if __name__ == "__main__":
    B, S = 2, 8
    VOCAB, EMBED = 64, 32

    key = jax.random.PRNGKey(0)
    k_tab, k_data = jax.random.split(key)

    # "word_representer": an opaque callable producing the (V, E) matrix.
    table = jax.random.normal(k_tab, (VOCAB, EMBED), dtype=jnp.float32)
    word_representer = lambda: table

    data = jax.random.randint(k_data, (B, S), 0, VOCAB, dtype=jnp.int32)

    # 2-D path (the main branch of the reference forward).
    out = var_embedding(data, word_representer)
    jax.block_until_ready(out)
    ref = jnp.take(table, data.reshape(-1), axis=0).reshape(B, S, EMBED)
    assert out.shape == (B, S, EMBED)
    assert bool(jnp.all(jnp.isfinite(out)))
    assert bool(jnp.allclose(out, ref, atol=1e-5, rtol=1e-5))

    # Non-2-D path (the `else` branch of the reference lookup).
    data_1d = data.reshape(-1)[:5]
    out_1d = var_embedding(data_1d, word_representer)
    jax.block_until_ready(out_1d)
    ref_1d = jnp.take(table, data_1d, axis=0)
    assert out_1d.shape == (5, EMBED)
    assert bool(jnp.allclose(out_1d, ref_1d, atol=1e-5, rtol=1e-5))

    print("KERNEL_OK")
</pallas_src>

<mosaic_0001>
module attributes {stable_mosaic.version = 11 : i64} {
  func.func @_gather_kernel(%arg0: i32, %arg1: memref<8x1xi32, #tpu.memory_space<vmem>>, %arg2: memref<64x32xf32, #tpu.memory_space<vmem>>, %arg3: memref<8x32xf32, #tpu.memory_space<vmem>>) attributes {dimension_semantics = [#tpu.dimension_semantics<parallel>], iteration_bounds = array<i64: 2>, scalar_prefetch = 0 : i64, scratch_operands = 0 : i64, tpu.core_type = #tpu.core_type<tc>, window_params = [{transform_indices = @transform_0, window_bounds = array<i64: 8, 1>}, {pipeline_mode = #tpu.pipeline_mode<synchronous>, transform_indices = @transform_1, window_bounds = array<i64: 64, 32>}, {transform_indices = @transform_2, window_bounds = array<i64: 8, 32>}]} {
    %c0 = arith.constant 0 : index
    %c0_0 = arith.constant 0 : index
    %0 = vector.load %arg1[%c0, %c0_0] : memref<8x1xi32, #tpu.memory_space<vmem>>, vector<8x1xi32>
    %1 = tpu.iota {dimensions = array<i32: 1>} : vector<8x64xi32>
    %2 = vector.broadcast %0 : vector<8x1xi32> to vector<8x64xi32>
    %3 = arith.cmpi eq, %2, %1 : vector<8x64xi32>
    %4 = arith.extui %3 : vector<8x64xi1> to vector<8x64xi32>
    %5 = arith.sitofp %4 : vector<8x64xi32> to vector<8x64xf32>
    %c0_1 = arith.constant 0 : index
    %c0_2 = arith.constant 0 : index
    %6 = vector.load %arg2[%c0_1, %c0_2] : memref<64x32xf32, #tpu.memory_space<vmem>>, vector<64x32xf32>
    %cst = arith.constant dense<0.000000e+00> : vector<8x32xf32>
    %7 = tpu.matmul %5, %6, %cst {dimension_numbers = #tpu.dot_dimension_numbers<[1], [0], [0], [1], [0, 0, 1, 1], [], []>} : vector<8x64xf32>, vector<64x32xf32>, vector<8x32xf32> -> vector<8x32xf32>
    %c0_3 = arith.constant 0 : index
    %c0_4 = arith.constant 0 : index
    %8 = vector.load %arg3[%c0_3, %c0_4] : memref<8x32xf32, #tpu.memory_space<vmem>>, vector<8x32xf32>
    tpu.vector_store %arg3[%c0_3, %c0_4], %7 {strides = array<i32>} : memref<8x32xf32, #tpu.memory_space<vmem>>, vector<8x32xf32>,
    return
  }
  func.func @transform_0(%arg0: i32) -> (i32, i32) {
    %c0_i32 = arith.constant 0 : i32
    %c0_i32_0 = arith.constant 0 : i32
    return %arg0, %c0_i32 : i32, i32
  }
  func.func @transform_1(%arg0: i32) -> (i32, i32) {
    %c0_i32 = arith.constant 0 : i32
    %c0_i32_0 = arith.constant 0 : i32
    %c0_i32_1 = arith.constant 0 : i32
    return %c0_i32, %c0_i32_0 : i32, i32
  }
  func.func @transform_2(%arg0: i32) -> (i32, i32) {
    %c0_i32 = arith.constant 0 : i32
    %c0_i32_0 = arith.constant 0 : i32
    return %arg0, %c0_i32 : i32, i32
  }
}

</mosaic_0001>

<bundles_post_ra>
// kernel: tpu_custom_call.1
= control target key start
LH: loop header
LB: loop body
LE: loop exit
PB: predicated region body
PF: predicated region fallthrough
CT: control target
= control target key end

     0   :  { %7 = vsyncpa [#allocation3], 0  ;;  %s592_s0 = inlined_call_operand.vmem [shape: s32[16,1], index: 0, kind: input, shape index: {}]   ;;  %s593_s1 = inlined_call_operand.vmem [shape: f32[64,32], index: 1, kind: input, shape index: {}]   ;;  %s594_s2 = inlined_call_operand.hbm [shape: f32[16,32], index: 2, kind: output, shape index: {}]  }
   0x1   :  { %9 = vsyncpa [#allocation3 + $0x1], 0  ;;  %s469_s9 = smov 0   ;;  %s471_s10 = smov 0  }
   0x2   :  { %s473_s11 = smov 0   ;;  %s475_s12 = smov 0  }
   0x3 LB: > { %s490_s13 = sadd.s32 4294967295, %s448_s12   ;;  %s305_s14 = sadd.s32 4294967294, %s448_s12   ;;  %s448_s12 = sphi %s475_s12, %s600_s12   ;;  %s444_s11 = sphi %s473_s11, %s599_s11   ;;  %s440_s10 = sphi %s471_s10, %s598_s10   ;;  %s436_s9 = sphi %s469_s9, %s597_s9  }
   0x4   : > { %s494_s15 = sadd.s32 1, %s448_s12   ;;  %s69_s16 = sadd.s32 1, %s444_s11 }
   0x5   : > { %s66_s17 = ssub.s32 %s448_s12, %s494_s15  ;;  %p79_p0 = scmp.ne.s32.totalorder %s444_s11, %s440_s10 }
   0x6   : > { %p67_p1 = scmp.eq.s32.totalorder %s66_s17, 0  ;;  %p80_p2 = scmp.eq.s32.totalorder %s490_s13, 1 }
   0x7   : > { %p85_p3 = scmp.ne.s32.totalorder %s440_s10, %s436_s9  ;;  %p86_p4 = scmp.eq.s32.totalorder %s305_s14, 1 }
   0x8   : > { %s505_s18 = scalar_select %p67_p1, %s444_s11, %s69_s16  }
   0x9   : > { %p507_p5 = por %p80_p2, %p79_p0  ;;  %p511_p6 = por %p86_p4, %p85_p3 }
   0xa   : > { %p308_p7 = scmp.ge.s32.totalorder %s448_s12, 1  ;;  %p114_p8 = scmp.lt.s32.totalorder %s448_s12, 3 }
   0xc   : > { %p115_p9 = pnand %p308_p7, %p114_p8 }
   0xd   : > { %p135_p10 = scmp.lt.s32.totalorder (!%p115_p9), %s490_s13, 1  ;;  %s132_s23 = sand.u32 (!%p115_p9), 1, %s440_s10  }
   0xe   : > { %118 = sbr.rel (%p115_p9) target bundleno = 357 (0x165), region = 28  ;;  %s309_s24 = sshll.u32 (!%p115_p9), %s132_s23, 3 }
   0xf   : > { %s134_s26 = scalar_lea.vmem (!%p115_p9), [#allocation2], %s309_s24 }
  0x10   : > { %s246_s27 = sshll.u32 (!%p115_p9), %s134_s26, 4  ;;  %s553_s27 = int_to_ptr.vmem [resolvable:$true] %s246_s27 }
  0x11   : > { %s388_s4 = scalar_lea.vmem (!%p115_p9), %s553_s27, 128 }
  0x12   : > { %p389_p11 = scmp.ne.s32.totalorder (!%p115_p9), %s553_s27, %s388_s4 }
  0x13   : > { %v155_v0 = vld [vmem:[%s593_s1 + $0x38] sm:$0xff]  ;;  %v450_v1 = vmov 0   ;;  %v451_v2 = vmov 0.0   ;;  %v154_v3 = vld [vmem:[%s593_s1 + $0x30] sm:$0xff]  ;;  %s136_s25 = scalar_select %p135_p10, %s490_s13, 1  ;;  %v153_v4 = vld [vmem:[%s593_s1 + $0x28] sm:$0xff]  ;;  %v140_v11 = vlaneseq }
  0x14   : > { %387 = vset.pattern.permute.xlu0 %v450_v1  ;;  %326 = vmatprep.subr.mxu0 %v451_v2  ;;  %vm452_vm0 = vmmov 0   ;;  %v152_v5 = vld [vmem:[%s593_s1 + $0x20] sm:$0xff]  ;;  %v151_v7 = vld [vmem:[%s593_s1 + $0x18] sm:$0xff]  ;;  %v150_v8 = vld [vmem:[%s593_s1 + $0x10] sm:$0xff]  ;;  %vm156_vm1 = vcmask 523264   ;;  %vm230_vm3 = vcmask 261120   ;;  %p390_p12 = pnand %p389_p11, %p507_p5 }
  0x15   : > { %327 = vmatpush3.msra.mxu0 %v155_v0  ;;  %s310_s28 = sshll.u32 %s136_s25, 3  ;;  %342 = vmatprep.mubr.msk.f32.mxu0 %vm452_vm0, %v451_v2  ;;  %v149_v9 = vld [vmem:[%s593_s1 + $0x8] sm:$0xff]  ;;  %v148_v10 = vld [vmem:[%s593_s1] sm:$0xff]  ;;  %v141_v12 = vand.u32 127, %v140_v11  ;;  %s314_s25 = sshll.u32 %s490_s13, 7 }
  0x16   : > { %328 = vmatprep.subr.mxu0 %v451_v2  ;;  %s138_s3 = scalar_lea.vmem %s592_s0, %s310_s28  ;;  %s551_s30 = scalar_lea.hbm %s594_s2, %s314_s25 }
  0x17   : > { %329 = vmatpush3.msra.mxu0 %v154_v3  ;;  %v139_v6 = vld [vmem:[%s138_s3] sm:$0xff]  ;;  %s233_s3 = scalar_lea.sflag [#allocation3], %s132_s23  ;;  %p391_p13 = pneg %p390_p12 }
  0x18   : > { %330 = vmatprep.subr.mxu0 %v451_v2  ;;  %143 = vperm.xlu0 %387, %v139_v6   ;;  %s453_s13 = smov [#allocation2]  }
  0x19   : > { %331 = vmatpush3.msra.mxu0 %v153_v4  ;;  %s392_s5 = sshll.u32 %s453_s13, 4  ;;  %s393_s5 = int_to_ptr.vmem [resolvable:$false] %s392_s5 }
  0x1a   : > { %332 = vmatprep.subr.mxu0 %v451_v2  ;;  %s394_s6 = scalar_lea.vmem %s393_s5, 256  ;;  %p395_p0 = scmp.lt.s32.totalorder %s553_s27, %s393_s5 }
  0x1b   : > { %333 = vmatpush3.msra.mxu0 %v152_v5  ;;  %p396_p1 = scmp.lt.s32.totalorder %s394_s6, %s388_s4 }
  0x1c   : > { %334 = vmatprep.subr.mxu0 %v451_v2 }
  0x1d   : > { %335 = vmatpush3.msra.mxu0 %v151_v7  ;;  %p397_p2 = por %p396_p1, %p395_p0 }
  0x1e   : > { %336 = vmatprep.subr.mxu0 %v451_v2 }
  0x1f   : > { %337 = vmatpush3.msra.mxu0 %v150_v8  ;;  %p398_p3 = pnand %p397_p2, %p391_p13 }
  0x20   : > { %338 = vmatprep.subr.mxu0 %v451_v2 }
  0x21   : > { %339 = vmatpush3.msra.mxu0 %v149_v9 }
  0x22   : > { %340 = vmatprep.subr.mxu0 %v451_v2 }
  0x23   : > { %341 = vmatpush3.msra.mxu0 %v148_v10 }
  0x93   : > { %v144_v13 = vpop.permute.xlu0 %143 }
  0x94   : > { %vm145_vm2 = vcmp.eq.s32.totalorder %v144_v13, %v141_v12 }
  0x95   : > { %v311_v14 = vsel %vm145_vm2, 1.0, %v451_v2 }
  0x96   : > { %343 = vmatmul.mubr.msk.f32.vlgmr.msra.gmra.mxu0 %vm156_vm1, %v311_v14 }
 0x156   : > { %v226_v15 = vpop.f32.mrf.mxu0 }
 0x157   : > { %231 = vst.msk [vmem:[%s134_s26] sm:$0xff] %vm230_vm3, %v226_v15 }
 0x158   : > { %v344_v16 = vpop.f32.mrf.mxu0 }
 0x159   : > { %401 = shalt.err (!%p398_p3)
}
 0x15a   : > { %s402_s7 = scalar_lea.hbm %s551_s30, 128  ;;  %s406_s16 = scalar_lea.hbm %s594_s2, 256 }
 0x15b   : > { %p403_p4 = scmp.ne.s32.totalorder %s551_s30, %s402_s7  ;;  %p407_p9 = scmp.lt.s32.totalorder %s551_s30, %s594_s2 }
 0x15c   : > { %p408_p10 = scmp.lt.s32.totalorder %s406_s16, %s402_s7 }
 0x15d   : > { %p404_p7 = pnand %p403_p4, %p507_p5 }
 0x15e   : > { %p409_p11 = por %p408_p10, %p407_p9 }
 0x15f   : > { %p405_p8 = pneg %p404_p7 }
 0x161   : > { %p410_p12 = pnand %p409_p11, %p405_p8 }
 0x163   : > { %413 = shalt.err (!%p410_p12)
}
 0x164   : > { %345 = dma.vmem_to_hbm [thread:$0]  (%p507_p5), %s553_s27, 128, %s551_s30, %s233_s3  }
 0x165 PF: > { %p351_p13 = scmp.ge.s32.totalorder %s448_s12, 2  ;;  %s258_s22 = sand.u32 1, %s436_s9  }
 0x166   : > { %s259_s23 = scalar_lea.sflag [#allocation3], %s258_s22 }
 0x167   : > { %p348_p0 = pnand %p351_p13, %p511_p6 }
 0x169   : > { %p349_p1 = pneg %p348_p0 }
 0x16b   : > { %431 = dma.done.wait (%p349_p1), %s259_s23, 128  }
 0x16c   : > { %433 = vsyncadd (%p349_p1), %s259_s23, 4294967168  ;;  %p12_p2 = scmp.ge.s32.totalorder %s494_s15, 4   ;;  %s597_s9 = smov %s440_s10 }
 0x16d   : > { %s598_s10 = smov %s444_s11  ;;  %s599_s11 = smov %s505_s18 }
 0x16e   : > { %s600_s12 = smov %s494_s15  ;;  %14 = sbr.rel (!%p12_p2) target bundleno = 3 (0x3), region = 63 }
 0x173   :  { %264 = vsyncpa [#allocation3], 1 }
 0x174   :  { %266 = vsyncpa [#allocation3 + $0x1], 1 }

</bundles_post_ra>
